<compile_context>
chip_gen: v5e
topology: v5e:2x2
jax: 0.10.0
libtpu: 0.0.40
codegen_flags: <defaults>
</compile_context>

<pallas_src>
import math

import jax
import jax.numpy as jnp
from jax.experimental import pallas as pl
from jax.experimental.pallas import tpu as pltpu

_LANE = 128


def _rnn_dropout_kernel(x_ref, m_ref, o_ref):
    # x_ref: (TB, TS, H), m_ref: (TB, 1, H) -> mask broadcasts over the seq axis.
    o_ref[...] = x_ref[...] * m_ref[...]


def _divisors_desc(n):
    ds = set()
    i = 1
    while i * i <= n:
        if n % i == 0:
            ds.add(i)
            ds.add(n // i)
        i += 1
    return sorted(ds, reverse=True)


def _sublane(dtype):
    # Sublane packing: 8 for f32, 16 for bf16, 32 for int8/fp8.
    return max(8, 32 // jnp.dtype(dtype).itemsize)


def _lane_fold(S, H):
    """Smallest k dividing S such that k*H is a multiple of 128 lanes (1 if H already is)."""
    if H % _LANE == 0:
        return 1
    k = _LANE // math.gcd(H, _LANE)
    return k if (k > 1 and S % k == 0) else 1


def _choose_tiles(B, S, H, dtype, target_bytes=8 << 20, megacore_min_bytes=2 << 20):
    """Pick (TB, TS): divisor-of-B/S tiles, sublane-aligned, ~target_bytes per block,
    with >= 2 grid blocks when the tensor is big enough (v7x megacore)."""
    itemsize = jnp.dtype(dtype).itemsize
    sub = _sublane(dtype)
    total_bytes = B * S * H * itemsize
    row_bytes = S * H * itemsize

    def largest_ts(limit):
        # Largest divisor of S that is a multiple of `sub` and <= limit.
        for d in _divisors_desc(S):
            if d <= limit and d % sub == 0:
                return d
        return None

    if row_bytes > target_bytes:
        TB = 1
        cap = max(1, target_bytes // (H * itemsize))
        ts = largest_ts(cap)
        if ts is None:
            # No divisible, sublane-aligned tile fits: fall back to a ragged tile.
            ts = min(S, max(sub, (cap // sub) * sub))
        TS = ts
    else:
        TS = S
        cap_rows = max(1, target_bytes // row_bytes)
        TB = 1
        for d in _divisors_desc(B):
            if d <= cap_rows:
                TB = d
                break

    # Megacore (v7x): guarantee >= 2 blocks on a parallel axis when it matters.
    n_blocks = pl.cdiv(B, TB) * pl.cdiv(S, TS)
    if n_blocks < 2 and total_bytes >= megacore_min_bytes:
        if B >= 2:
            for d in _divisors_desc(B):
                if d <= B // 2:
                    TB = d
                    break
        else:
            ts = largest_ts(S // 2)
            if ts is not None:
                TS = ts
            elif S >= 2 * sub:
                TS = (S // (2 * sub)) * sub
    return TB, TS


def rnn_dropout(x, key, p: float = 0.5, training: bool = True, *,
                min_pallas_bytes: int = 1 << 20):
    """Pallas implementation of RNNDropout.forward.  x: (batch, seq_len, hidden)."""
    if (not training) or p == 0.0:
        return x
    if p >= 1.0:
        # PyTorch dropout with p=1 zeroes everything; avoid the 1/(1-p) div-by-zero.
        return jnp.zeros_like(x)

    B, S, H = x.shape
    scale = 1.0 / (1.0 - p)
    # (B, 1, H) mask, constant along seq, scaled by 1/(1-p)  == dropout_mask().
    mask = (
        jax.random.bernoulli(key, 1.0 - p, (B, 1, H)).astype(x.dtype)
        * jnp.asarray(scale, dtype=x.dtype)
    )

    itemsize = jnp.dtype(x.dtype).itemsize
    total_bytes = B * S * H * itemsize
    if total_bytes < min_pallas_bytes:
        # Tiny input: kernel launch overhead dominates; let XLA fuse the multiply.
        return x * mask

    # Lane-dense output slab: fold k seq steps into the lane dim if H % 128 != 0.
    k = _lane_fold(S, H)
    if k > 1:
        x_in = x.reshape(B, S // k, k * H)
        mask_in = jnp.tile(mask, (1, 1, k))
    else:
        x_in, mask_in = x, mask
    Bf, Sf, Hf = x_in.shape

    TB, TS = _choose_tiles(Bf, Sf, Hf, x.dtype)
    grid = (pl.cdiv(Bf, TB), pl.cdiv(Sf, TS))

    # Explicit VMEM budget: 2 buffers x (x block + out block + mask block) + headroom,
    # kept well under v7x's 64 MiB physical VMEM.
    block_bytes = TB * TS * Hf * itemsize
    mask_bytes = TB * Hf * itemsize
    vmem_limit = 2 * (2 * block_bytes + mask_bytes) + (2 << 20)
    vmem_limit = int(max(16 << 20, min(vmem_limit, 48 << 20)))

    out = pl.pallas_call(
        _rnn_dropout_kernel,
        out_shape=jax.ShapeDtypeStruct((Bf, Sf, Hf), x.dtype),
        grid=grid,
        in_specs=[
            pl.BlockSpec((TB, TS, Hf), lambda bi, si: (bi, si, 0)),
            pl.BlockSpec((TB, 1, Hf), lambda bi, si: (bi, 0, 0)),
        ],
        out_specs=pl.BlockSpec((TB, TS, Hf), lambda bi, si: (bi, si, 0)),
        compiler_params=pltpu.CompilerParams(
            dimension_semantics=("parallel", "parallel"),
            vmem_limit_bytes=vmem_limit,
        ),
    )(x_in, mask_in)

    return out.reshape(B, S, H) if k > 1 else out


if __name__ == "__main__":
    p = 0.5
    scale = 1.0 / (1.0 - p)
    key = jax.random.PRNGKey(0)
    kx, kd = jax.random.split(key)

    # Small shapes consistent with the module's forward: (batch, seq_len, hidden).
    B, S, H = 2, 8, 128
    x = jax.random.normal(kx, (B, S, H), dtype=jnp.float32)

    # Force the Pallas path at this tiny size so the kernel itself is exercised.
    out = rnn_dropout(x, kd, p=p, training=True, min_pallas_bytes=0)
    out = jax.block_until_ready(out)
    assert out.shape == x.shape

    # Exact reference: regenerate the same mask (same key) and compare.
    mask = (
        jax.random.bernoulli(kd, 1.0 - p, (B, 1, H)).astype(x.dtype)
        * jnp.asarray(scale, x.dtype)
    )
    ref = x * mask
    assert bool(jnp.allclose(out, ref)), "Pallas output != x * mask reference"

    # Hidden not a multiple of 128 -> lane-fold path (reshape to (B, S/k, k*H)).
    B2, S2, H2 = 2, 8, 32
    x2 = jax.random.normal(kx, (B2, S2, H2), dtype=jnp.float32)
    out2 = jax.block_until_ready(
        rnn_dropout(x2, kd, p=p, training=True, min_pallas_bytes=0)
    )
    mask2 = (
        jax.random.bernoulli(kd, 1.0 - p, (B2, 1, H2)).astype(x2.dtype)
        * jnp.asarray(scale, x2.dtype)
    )
    assert bool(jnp.allclose(out2, x2 * mask2)), "lane-fold path mismatch"

    # Eval-mode / p==0 are identity; p>=1 zeroes; default small-size fast path matches.
    assert bool(jnp.all(rnn_dropout(x, kd, p=p, training=False) == x))
    assert bool(jnp.all(rnn_dropout(x, kd, p=0.0, training=True) == x))
    assert bool(jnp.all(rnn_dropout(x, kd, p=1.0, training=True) == 0.0))
    assert bool(jnp.allclose(rnn_dropout(x, kd, p=p, training=True), ref))

    print("KERNEL_OK")
</pallas_src>

<mosaic_0001>
module attributes {stable_mosaic.version = 11 : i64} {
  func.func @_rnn_dropout_kernel(%arg0: i32, %arg1: i32, %arg2: memref<2x8x128xf32, #tpu.memory_space<vmem>>, %arg3: memref<2x1x128xf32, #tpu.memory_space<vmem>>, %arg4: memref<2x8x128xf32, #tpu.memory_space<vmem>>) attributes {dimension_semantics = [#tpu.dimension_semantics<parallel>, #tpu.dimension_semantics<parallel>], iteration_bounds = array<i64: 1, 1>, scalar_prefetch = 0 : i64, scratch_operands = 0 : i64, tpu.core_type = #tpu.core_type<tc>, window_params = [{transform_indices = @transform_0, window_bounds = array<i64: 2, 8, 128>}, {transform_indices = @transform_1, window_bounds = array<i64: 2, 1, 128>}, {transform_indices = @transform_2, window_bounds = array<i64: 2, 8, 128>}]} {
    %c0 = arith.constant 0 : index
    %c0_0 = arith.constant 0 : index
    %c0_1 = arith.constant 0 : index
    %0 = vector.load %arg2[%c0, %c0_0, %c0_1] : memref<2x8x128xf32, #tpu.memory_space<vmem>>, vector<2x8x128xf32>
    %c0_2 = arith.constant 0 : index
    %c0_3 = arith.constant 0 : index
    %c0_4 = arith.constant 0 : index
    %1 = vector.load %arg3[%c0_2, %c0_3, %c0_4] : memref<2x1x128xf32, #tpu.memory_space<vmem>>, vector<2x1x128xf32>
    %2 = vector.broadcast %1 : vector<2x1x128xf32> to vector<2x8x128xf32>
    %3 = arith.mulf %0, %2 : vector<2x8x128xf32>
    %c0_5 = arith.constant 0 : index
    %c0_6 = arith.constant 0 : index
    %c0_7 = arith.constant 0 : index
    %4 = vector.load %arg4[%c0_5, %c0_6, %c0_7] : memref<2x8x128xf32, #tpu.memory_space<vmem>>, vector<2x8x128xf32>
    tpu.vector_store %arg4[%c0_5, %c0_6, %c0_7], %3 {strides = array<i32>} : memref<2x8x128xf32, #tpu.memory_space<vmem>>, vector<2x8x128xf32>,
    return
  }
  func.func @transform_0(%arg0: i32, %arg1: i32) -> (i32, i32, i32) {
    %c0_i32 = arith.constant 0 : i32
    %c0_i32_0 = arith.constant 0 : i32
    return %arg0, %arg1, %c0_i32 : i32, i32, i32
  }
  func.func @transform_1(%arg0: i32, %arg1: i32) -> (i32, i32, i32) {
    %c0_i32 = arith.constant 0 : i32
    %c0_i32_0 = arith.constant 0 : i32
    %c0_i32_1 = arith.constant 0 : i32
    return %arg0, %c0_i32, %c0_i32_0 : i32, i32, i32
  }
  func.func @transform_2(%arg0: i32, %arg1: i32) -> (i32, i32, i32) {
    %c0_i32 = arith.constant 0 : i32
    %c0_i32_0 = arith.constant 0 : i32
    return %arg0, %arg1, %c0_i32 : i32, i32, i32
  }
}

</mosaic_0001>

<bundles_post_ra>
// kernel: tpu_custom_call.1
= control target key start
LH: loop header
LB: loop body
LE: loop exit
PB: predicated region body
PF: predicated region fallthrough
CT: control target
= control target key end

     0   :  { %7 = vsyncpa [#allocation3], 0  ;;  %s202_s0 = inlined_call_operand.hbm [shape: f32[2,8,128], index: 0, kind: input, shape index: {}]   ;;  %s203_s1 = inlined_call_operand.hbm [shape: f32[2,1,128], index: 1, kind: input, shape index: {}]   ;;  %s204_s2 = inlined_call_operand.hbm [shape: f32[2,8,128], index: 2, kind: output, shape index: {}]  }
   0x1   :  { %8 = vsyncpa [#allocation6], 0 }
   0x2   :  { %9 = vsyncpa [#allocation4], 0  ;;  %s14_s11 = sshll.u32 %s202_s0, 4  ;;  %s165_s12 = smov [#allocation2]   ;;  %s15_s11 = int_to_ptr.hbm [resolvable:$true] %s14_s11 }
   0x3   :  { %s16_s13 = sshll.u32 %s165_s12, 4  ;;  %s27_s16 = sshll.u32 %s203_s1, 4  ;;  %s17_s13 = int_to_ptr.vmem [resolvable:$true] %s16_s13  ;;  %s28_s16 = int_to_ptr.hbm [resolvable:$true] %s27_s16 }
   0x4   :  { %s166_s17 = smov 128   ;;  %s167_s18 = smov 8  }
   0x5   :  { %22 = dma.hbm_to_vmem [thread:$0]  %s15_s11, 256, %s17_s13, [#allocation3], %s166_s17, %s166_s17, %s167_s18  }
   0x6   :  { %s168_s19 = smov [#allocation5]   ;;  %s169_s21 = smov 16  }
   0x7   :  { %s29_s20 = sshll.u32 %s168_s19, 4  ;;  %s170_s0 = smov 1   ;;  %s30_s20 = int_to_ptr.vmem [resolvable:$true] %s29_s20 }
   0x8   :  { %35 = dma.hbm_to_vmem [thread:$0]  %s28_s16, 32, %s30_s20, [#allocation6], %s169_s21, %s169_s21, %s170_s0  }
   0x9   :  { %159 = dma.done.wait [#allocation3], 256  }
   0xa   :  { %160 = vsyncadd [#allocation3], 4294967040 }
   0xb   :  { %161 = dma.done.wait [#allocation6], 32  }
   0xc   :  { %162 = vsyncadd [#allocation6], 4294967264  ;;  %s64_s1 = sshll.u32 %s204_s2, 4  ;;  %v44_v0 = vld [vmem:[#allocation2] sm:$0xff]  ;;  %v85_v1 = vld [vmem:[#allocation5] ss:$0 sm:$0xff]  ;;  %s65_s1 = int_to_ptr.hbm [resolvable:$true] %s64_s1 }
   0xd   :  { %s171_s24 = smov [#allocation7]   ;;  %v45_v2 = vld [vmem:[#allocation2 + $0x8] sm:$0xff]  ;;  %v86_v3 = vld [vmem:[#allocation5 + $0x1] ss:$0 sm:$0xff]  ;;  %v54_v4 = vmul.f32 %v85_v1, %v44_v0 }
   0xe   :  { %s62_s25 = sshll.u32 %s171_s24, 4  ;;  %v55_v5 = vmul.f32 %v86_v3, %v45_v2  ;;  %s63_s25 = int_to_ptr.vmem [resolvable:$true] %s62_s25 }
   0xf   :  { %56 = vst [vmem:[#allocation7] sm:$0xff] %v54_v4 }
  0x10   :  { %57 = vst [vmem:[#allocation7 + $0x8] sm:$0xff] %v55_v5 }
  0x11   :  { %70 = dma.vmem_to_hbm [thread:$0]  %s63_s25, 256, %s65_s1, [#allocation4], %s166_s17, %s166_s17, %s167_s18  }
  0x12   :  { %163 = dma.done.wait [#allocation4], 256  }
  0x13   :  { %164 = vsyncadd [#allocation4], 4294967040 }
  0x14   :  { %75 = vsyncpa [#allocation3], 1 }
  0x15   :  { %76 = vsyncpa [#allocation6], 1 }
  0x16   :  { %77 = vsyncpa [#allocation4], 1 }

</bundles_post_ra>
